<compile_context>
chip_gen: v6e
topology: v6e:2x2x1
jax: 0.10.0
libtpu: 0.0.40
codegen_flags: <defaults>
</compile_context>

<pallas_src>
import functools

import jax
import jax.numpy as jnp
from jax.experimental import pallas as pl
from jax.experimental.pallas import tpu as pltpu

N_QUBITS = 2
N_LAYERS = 4
LANES = 128


def _round_up(n, m):
    return ((n + m - 1) // m) * m


def hybrid_kernel(coef_ref, x_ref, o_ref):
    # coef_ref: (11,) f32 in SMEM -- folded circuit + Linear coefficients
    # x_ref   : (2, TILE_R, 128)  -- feature-major batch tile of embedding angles
    # o_ref   : (TILE_R, 128)     -- classifier output per sample
    h0 = 0.5 * x_ref[0]
    h1 = 0.5 * x_ref[1]
    c0 = jnp.cos(h0)
    s0 = jnp.sin(h0)
    c1 = jnp.cos(h1)
    s1 = jnp.sin(h1)
    u = c0 * c1
    v = s0 * s1
    p = c0 * s1
    q = s0 * c1
    o_ref[...] = (
        coef_ref[0] * (u * u)
        + coef_ref[1] * (u * v)
        + coef_ref[2] * (v * v)
        + coef_ref[3] * (p * p)
        + coef_ref[4] * (p * q)
        + coef_ref[5] * (q * q)
        + coef_ref[6] * (u * p)
        + coef_ref[7] * (u * q)
        + coef_ref[8] * (v * p)
        + coef_ref[9] * (v * q)
        + coef_ref[10]
    )


def _rx_mat(theta):
    c = jnp.cos(theta / 2).astype(jnp.complex64)
    s = (-1j * jnp.sin(theta / 2)).astype(jnp.complex64)
    return jnp.stack([jnp.stack([c, s]), jnp.stack([s, c])])


def _build_coeffs(q_weights, lin_w, lin_b):
    """Fold BasicEntanglerLayers + PauliZ expvals + Linear(2,1) into 11 scalars.

    After AngleEmbedding the state is psi = r + i*m with
      r = [u, 0, 0, -v],  m = [0, -p, -q, 0],
      u = c0*c1, v = s0*s1, p = c0*s1, q = s0*c1.
    For Hermitian M = A + iB:  <psi|M|psi> = r^T A r + m^T A m - 2 r^T B m,
    which is a real quadratic form in (u, v, p, q) with 10 coefficients (+ bias).
    """
    I2 = jnp.eye(2, dtype=jnp.complex64)
    CNOT = jnp.array(
        [[1, 0, 0, 0], [0, 1, 0, 0], [0, 0, 0, 1], [0, 0, 1, 0]], jnp.complex64
    )
    U = jnp.eye(4, dtype=jnp.complex64)
    for l in range(N_LAYERS):
        U_l = (
            CNOT
            @ jnp.kron(I2, _rx_mat(q_weights[l, 1]))
            @ jnp.kron(_rx_mat(q_weights[l, 0]), I2)
        )
        U = U_l @ U
    Z0 = jnp.diag(jnp.array([1, 1, -1, -1], jnp.complex64))
    Z1 = jnp.diag(jnp.array([1, -1, 1, -1], jnp.complex64))
    w0 = lin_w[0, 0].astype(jnp.complex64)
    w1 = lin_w[0, 1].astype(jnp.complex64)
    M = U.conj().T @ (w0 * Z0 + w1 * Z1) @ U
    A = jnp.real(M)
    Bm = jnp.imag(M)
    coefs = jnp.stack(
        [
            A[0, 0],                # u*u
            -2.0 * A[0, 3],         # u*v
            A[3, 3],                # v*v
            A[1, 1],                # p*p
            2.0 * A[1, 2],          # p*q
            A[2, 2],                # q*q
            2.0 * Bm[0, 1],         # u*p
            2.0 * Bm[0, 2],         # u*q
            -2.0 * Bm[3, 1],        # v*p
            -2.0 * Bm[3, 2],        # v*q
            lin_b[0],               # bias
        ]
    ).astype(jnp.float32)
    return coefs


@functools.partial(jax.jit, static_argnames=("tile_r",))
def hybrid_forward(x, q_weights, lin_w, lin_b, tile_r=128):
    B = x.shape[0]
    coefs = _build_coeffs(
        q_weights.astype(jnp.float32),
        lin_w.astype(jnp.float32),
        lin_b.astype(jnp.float32),
    )

    rows = pl.cdiv(B, LANES)
    tile = min(tile_r, _round_up(rows, 8))      # sublane multiple of 8
    rows_pad = _round_up(rows, tile)
    total = rows_pad * LANES

    # Pad batch, then lay it out feature-major with batch on (sublane, lane).
    xp = jnp.zeros((total, N_QUBITS), jnp.float32).at[:B].set(x.astype(jnp.float32))
    xp = xp.T.reshape(N_QUBITS, rows_pad, LANES)

    out = pl.pallas_call(
        hybrid_kernel,
        out_shape=jax.ShapeDtypeStruct((rows_pad, LANES), jnp.float32),
        grid=(rows_pad // tile,),
        in_specs=[
            pl.BlockSpec(memory_space=pltpu.MemorySpace.SMEM),           # coefficients
            pl.BlockSpec((N_QUBITS, tile, LANES), lambda i: (0, i, 0)),  # angles
        ],
        out_specs=pl.BlockSpec((tile, LANES), lambda i: (i, 0)),
        compiler_params=pltpu.CompilerParams(
            dimension_semantics=("parallel",),
            vmem_limit_bytes=32 * 1024 * 1024,
        ),
    )(coefs, xp)

    return out.reshape(-1)[:B].reshape(B, 1)


# ---------------- pure-JAX reference (statevector simulation) ----------------
def _ref_single(angles, qw):
    I2 = jnp.eye(2, dtype=jnp.complex64)
    CNOT = jnp.array(
        [[1, 0, 0, 0], [0, 1, 0, 0], [0, 0, 0, 1], [0, 0, 1, 0]], jnp.complex64
    )
    state = jnp.zeros(4, jnp.complex64).at[0].set(1.0)
    state = jnp.kron(_rx_mat(angles[0]), I2) @ state
    state = jnp.kron(I2, _rx_mat(angles[1])) @ state
    for l in range(N_LAYERS):
        state = jnp.kron(_rx_mat(qw[l, 0]), I2) @ state
        state = jnp.kron(I2, _rx_mat(qw[l, 1])) @ state
        state = CNOT @ state
    p = jnp.abs(state) ** 2
    return jnp.stack([p[0] + p[1] - p[2] - p[3], p[0] - p[1] + p[2] - p[3]])


def reference(x, qw, lw, lb):
    z = jax.vmap(lambda a: _ref_single(a, qw))(x)  # (B, 2)
    return z @ lw.T + lb[None, :]


if __name__ == "__main__":
    key = jax.random.PRNGKey(0)
    k_x, k_q, k_w, k_b = jax.random.split(key, 4)

    B = 8
    x = jax.random.uniform(k_x, (B, N_QUBITS), jnp.float32, minval=-1.0, maxval=1.0)
    # TorchLayer default init: uniform in [0, 2*pi)
    q_weights = jax.random.uniform(
        k_q, (N_LAYERS, N_QUBITS), jnp.float32, minval=0.0, maxval=2.0 * jnp.pi
    )
    # nn.Linear(2, 1) init: uniform(-1/sqrt(2), 1/sqrt(2))
    bound = 1.0 / jnp.sqrt(2.0)
    lin_w = jax.random.uniform(k_w, (1, N_QUBITS), jnp.float32, -bound, bound)
    lin_b = jax.random.uniform(k_b, (1,), jnp.float32, -bound, bound)

    out = hybrid_forward(x, q_weights, lin_w, lin_b)
    out = jax.block_until_ready(out)

    ref = reference(x, q_weights, lin_w, lin_b)
    assert out.shape == (B, 1)
    assert jnp.allclose(out, ref, rtol=1e-4, atol=1e-4), (out, ref)

    print("KERNEL_OK")
</pallas_src>

<mosaic_0001>
module attributes {stable_mosaic.version = 11 : i64} {
  func.func @hybrid_kernel(%arg0: i32, %arg1: memref<11xf32, #tpu.memory_space<smem>>, %arg2: memref<2x8x128xf32, #tpu.memory_space<vmem>>, %arg3: memref<8x128xf32, #tpu.memory_space<vmem>>) attributes {dimension_semantics = [#tpu.dimension_semantics<parallel>], iteration_bounds = array<i64: 1>, scalar_prefetch = 0 : i64, scratch_operands = 0 : i64, tpu.core_type = #tpu.core_type<tc>, window_params = [{transform_indices = @transform_0, window_bounds = array<i64: 11>}, {transform_indices = @transform_1, window_bounds = array<i64: 2, 8, 128>}, {transform_indices = @transform_2, window_bounds = array<i64: 8, 128>}]} {
    %c0 = arith.constant 0 : index
    %c0_0 = arith.constant 0 : index
    %c0_1 = arith.constant 0 : index
    %0 = vector.load %arg2[%c0, %c0_0, %c0_1] : memref<2x8x128xf32, #tpu.memory_space<vmem>>, vector<1x8x128xf32>
    %1 = vector.shape_cast %0 : vector<1x8x128xf32> to vector<8x128xf32>
    %cst = arith.constant 5.000000e-01 : f32
    %2 = vector.broadcast %cst : f32 to vector<8x128xf32>
    %3 = arith.mulf %2, %1 : vector<8x128xf32>
    %c1 = arith.constant 1 : index
    %c0_2 = arith.constant 0 : index
    %c0_3 = arith.constant 0 : index
    %4 = vector.load %arg2[%c1, %c0_2, %c0_3] : memref<2x8x128xf32, #tpu.memory_space<vmem>>, vector<1x8x128xf32>
    %5 = vector.shape_cast %4 : vector<1x8x128xf32> to vector<8x128xf32>
    %cst_4 = arith.constant 5.000000e-01 : f32
    %6 = vector.broadcast %cst_4 : f32 to vector<8x128xf32>
    %7 = arith.mulf %6, %5 : vector<8x128xf32>
    %8 = math.cos %3 : vector<8x128xf32>
    %9 = math.sin %3 : vector<8x128xf32>
    %10 = math.cos %7 : vector<8x128xf32>
    %11 = math.sin %7 : vector<8x128xf32>
    %12 = arith.mulf %8, %10 : vector<8x128xf32>
    %13 = arith.mulf %9, %11 : vector<8x128xf32>
    %14 = arith.mulf %8, %11 : vector<8x128xf32>
    %15 = arith.mulf %9, %10 : vector<8x128xf32>
    %c0_5 = arith.constant 0 : index
    %16 = memref.load %arg1[%c0_5] : memref<11xf32, #tpu.memory_space<smem>>
    %17 = arith.mulf %12, %12 : vector<8x128xf32>
    %18 = vector.broadcast %16 : f32 to vector<8x128xf32>
    %19 = arith.mulf %18, %17 : vector<8x128xf32>
    %c1_6 = arith.constant 1 : index
    %20 = memref.load %arg1[%c1_6] : memref<11xf32, #tpu.memory_space<smem>>
    %21 = arith.mulf %12, %13 : vector<8x128xf32>
    %22 = vector.broadcast %20 : f32 to vector<8x128xf32>
    %23 = arith.mulf %22, %21 : vector<8x128xf32>
    %24 = arith.addf %19, %23 : vector<8x128xf32>
    %c2 = arith.constant 2 : index
    %25 = memref.load %arg1[%c2] : memref<11xf32, #tpu.memory_space<smem>>
    %26 = arith.mulf %13, %13 : vector<8x128xf32>
    %27 = vector.broadcast %25 : f32 to vector<8x128xf32>
    %28 = arith.mulf %27, %26 : vector<8x128xf32>
    %29 = arith.addf %24, %28 : vector<8x128xf32>
    %c3 = arith.constant 3 : index
    %30 = memref.load %arg1[%c3] : memref<11xf32, #tpu.memory_space<smem>>
    %31 = arith.mulf %14, %14 : vector<8x128xf32>
    %32 = vector.broadcast %30 : f32 to vector<8x128xf32>
    %33 = arith.mulf %32, %31 : vector<8x128xf32>
    %34 = arith.addf %29, %33 : vector<8x128xf32>
    %c4 = arith.constant 4 : index
    %35 = memref.load %arg1[%c4] : memref<11xf32, #tpu.memory_space<smem>>
    %36 = arith.mulf %14, %15 : vector<8x128xf32>
    %37 = vector.broadcast %35 : f32 to vector<8x128xf32>
    %38 = arith.mulf %37, %36 : vector<8x128xf32>
    %39 = arith.addf %34, %38 : vector<8x128xf32>
    %c5 = arith.constant 5 : index
    %40 = memref.load %arg1[%c5] : memref<11xf32, #tpu.memory_space<smem>>
    %41 = arith.mulf %15, %15 : vector<8x128xf32>
    %42 = vector.broadcast %40 : f32 to vector<8x128xf32>
    %43 = arith.mulf %42, %41 : vector<8x128xf32>
    %44 = arith.addf %39, %43 : vector<8x128xf32>
    %c6 = arith.constant 6 : index
    %45 = memref.load %arg1[%c6] : memref<11xf32, #tpu.memory_space<smem>>
    %46 = arith.mulf %12, %14 : vector<8x128xf32>
    %47 = vector.broadcast %45 : f32 to vector<8x128xf32>
    %48 = arith.mulf %47, %46 : vector<8x128xf32>
    %49 = arith.addf %44, %48 : vector<8x128xf32>
    %c7 = arith.constant 7 : index
    %50 = memref.load %arg1[%c7] : memref<11xf32, #tpu.memory_space<smem>>
    %51 = arith.mulf %12, %15 : vector<8x128xf32>
    %52 = vector.broadcast %50 : f32 to vector<8x128xf32>
    %53 = arith.mulf %52, %51 : vector<8x128xf32>
    %54 = arith.addf %49, %53 : vector<8x128xf32>
    %c8 = arith.constant 8 : index
    %55 = memref.load %arg1[%c8] : memref<11xf32, #tpu.memory_space<smem>>
    %56 = arith.mulf %13, %14 : vector<8x128xf32>
    %57 = vector.broadcast %55 : f32 to vector<8x128xf32>
    %58 = arith.mulf %57, %56 : vector<8x128xf32>
    %59 = arith.addf %54, %58 : vector<8x128xf32>
    %c9 = arith.constant 9 : index
    %60 = memref.load %arg1[%c9] : memref<11xf32, #tpu.memory_space<smem>>
    %61 = arith.mulf %13, %15 : vector<8x128xf32>
    %62 = vector.broadcast %60 : f32 to vector<8x128xf32>
    %63 = arith.mulf %62, %61 : vector<8x128xf32>
    %64 = arith.addf %59, %63 : vector<8x128xf32>
    %c10 = arith.constant 10 : index
    %65 = memref.load %arg1[%c10] : memref<11xf32, #tpu.memory_space<smem>>
    %66 = vector.broadcast %65 : f32 to vector<8x128xf32>
    %67 = arith.addf %64, %66 : vector<8x128xf32>
    %c0_7 = arith.constant 0 : index
    %c0_8 = arith.constant 0 : index
    %68 = vector.load %arg3[%c0_7, %c0_8] : memref<8x128xf32, #tpu.memory_space<vmem>>, vector<8x128xf32>
    tpu.vector_store %arg3[%c0_7, %c0_8], %67 {strides = array<i32>} : memref<8x128xf32, #tpu.memory_space<vmem>>, vector<8x128xf32>,
    return
  }
  func.func @transform_0(%arg0: i32) -> i32 {
    %c0_i32 = arith.constant 0 : i32
    %c0_i32_0 = arith.constant 0 : i32
    return %c0_i32 : i32
  }
  func.func @transform_1(%arg0: i32) -> (i32, i32, i32) {
    %c0_i32 = arith.constant 0 : i32
    %c0_i32_0 = arith.constant 0 : i32
    %c0_i32_1 = arith.constant 0 : i32
    return %c0_i32, %arg0, %c0_i32_0 : i32, i32, i32
  }
  func.func @transform_2(%arg0: i32) -> (i32, i32) {
    %c0_i32 = arith.constant 0 : i32
    %c0_i32_0 = arith.constant 0 : i32
    return %arg0, %c0_i32 : i32, i32
  }
}

</mosaic_0001>

<bundles_post_ra>
// kernel: hybrid_forward.1
= control target key start
LH: loop header
LB: loop body
LE: loop exit
PB: predicated region body
PF: predicated region fallthrough
CT: control target
= control target key end

     0   :  { %7 = vsyncpa [#allocation3], 0  ;;  %s704_s0 = inlined_call_operand.vmem [shape: f32[11], index: 0, kind: input, shape index: {}]   ;;  %s705_s1 = inlined_call_operand.vmem [shape: f32[2,8,128], index: 1, kind: input, shape index: {}]   ;;  %s706_s2 = inlined_call_operand.vmem [shape: f32[8,128], index: 2, kind: output, shape index: {}]  }
   0x1   :  { %s14_s11 = sshll.u32 %s704_s0, 4  ;;  %s15_s11 = int_to_ptr.vmem [resolvable:$true] %s14_s11 }
   0x2   :  { %s555_s12 = scalar_lea.vmem %s15_s11, 16  ;;  %p560_p1 = scmp.lt.s32.totalorder %s15_s11, %s15_s11 }
   0x3   :  { %p556_p0 = scmp.ne.s32.totalorder %s15_s11, %s555_s12  ;;  %p561_p2 = scmp.lt.s32.totalorder %s555_s12, %s555_s12 }
   0x5   :  { %p562_p3 = por %p561_p2, %p560_p1 }
   0x7   :  { %p563_p4 = pnand %p562_p3, %p556_p0 }
   0x9   :  { %566 = shalt.err (!%p563_p4)
}
   0xa   :  { %s569_s13 = smov [#allocation2]  }
   0xb   :  { %17 = dma.vmem_to_smem %s15_s11, 16, %s569_s13, [#allocation3]  }
   0xc   :  { %567 = dma.done.wait [#allocation3], 16  }
   0xd   :  { %568 = vsyncadd [#allocation3], 4294967280 }
   0xe   :  { %23 = sfence }
   0xf   :  { %v24_v0 = vld [vmem:[%s705_s1] sm:$0xff]  ;;  %v505_v1 = vld [vmem:[%s705_s1 + $0x8] sm:$0xff]  ;;  %v570_v26 = vmov 683565275   ;;  %v571_v28 = vmov 2475754826  }
  0x10   :  { %v600_v2 = vmul.f32 0.5, %v24_v0  ;;  %v602_v3 = vmul.f32 0.5, %v505_v1  ;;  %v572_v30 = vmov 2131351028   ;;  %v573_v32 = vmov 2102212464  }
  0x11   :  { %v574_v34 = vmov 920167782   ;;  %v575_v42 = vmov 1326507024   ;;  %s676_s0 = sld [smem:[#allocation2]] }
  0x12   :  { %v29_v4 = vand.u32 2147483647, %v600_v2  ;;  %v32_v5 = vand.u32 2139095040, %v600_v2  ;;  %v236_v6 = vand.u32 2147483647, %v602_v3  ;;  %v239_v7 = vand.u32 2139095040, %v602_v3 }
  0x13   :  { %vm31_vm14 = vcmp.lt.s32.totalorder %v600_v2, 0  ;;  %s678_s1 = sld [smem:[#allocation2 + $0x1]] }
  0x14   :  { %v33_v8 = vshrl.u32 %v32_v5, 23  ;;  %v36_v9 = vand.u32 8388607, %v29_v4  ;;  %v240_v10 = vshrl.u32 %v239_v7, 23  ;;  %v243_v11 = vand.u32 8388607, %v236_v6 }
  0x15   :  { %vm663_vm15 = vcmp.le.f32.partialorder %v29_v4, 0.7853982  ;;  %s681_s18 = sld [smem:[#allocation2 + $0x2]] }
  0x16   :  { %v506_v12 = vadd.s32 4294967169, %v33_v8  ;;  %v514_v13 = vadd.s32 4294967169, %v240_v10  ;;  %v37_v15 = vor.u32 8388608, %v36_v9  ;;  %v244_v16 = vor.u32 8388608, %v243_v11  ;;  %s683_s19 = sld [smem:[#allocation2 + $0x3]] }
  0x17   :  { %s691_s20 = sld [smem:[#allocation2 + $0x4]] }
  0x18   :  { %v39_v14 = vadd.s32 1, %v506_v12  ;;  %v246_v17 = vadd.s32 1, %v514_v13  ;;  %v612_v22 = vshll.u32 %v37_v15, 8  ;;  %v614_v24 = vshll.u32 %v244_v16, 8  ;;  %s693_s21 = sld [smem:[#allocation2 + $0x5]] }
  0x19   :  { %s527_s22 = sld [smem:[#allocation2 + $0x6]] }
  0x1a   :  { %vm40_vm0 = vcmp.gt.s32.totalorder %v39_v14, 0  ;;  %vm247_vm1 = vcmp.gt.s32.totalorder %v246_v17, 0  ;;  %s528_s23 = sld [smem:[#allocation2 + $0x7]] }
  0x1b   :  { %v41_v18 = vsel %vm40_vm0, %v39_v14, 0  ;;  %v248_v21 = vsel %vm247_vm1, %v246_v17, 0  ;;  %vm238_vm0 = vcmp.lt.s32.totalorder %v602_v3, 0  ;;  %vm237_vm1 = vcmp.le.f32.partialorder %v236_v6, 0.7853982  ;;  %s529_s24 = sld [smem:[#allocation2 + $0x8]] }
  0x1c   :  { %v42_v19 = vshrl.u32 %v41_v18, 5  ;;  %v43_v20 = vand.u32 31, %v41_v18  ;;  %v250_v23 = vand.u32 31, %v248_v21  ;;  %v616_v36 = vshrl.u32 %v248_v21, 5  ;;  %s530_s25 = sld [smem:[#allocation2 + $0x9]] }
  0x1d   :  { %s531_s26 = sld [smem:[#allocation2 + $0xa]] }
  0x1e   :  { %v44_v25 = vsub.s32 32, %v43_v20  ;;  %v46_v27 = vshll.u32 %v570_v26, %v43_v20  ;;  %v49_v29 = vshll.u32 %v571_v28, %v43_v20  ;;  %v52_v31 = vshll.u32 %v572_v30, %v43_v20 }
  0x1f   :  { %v55_v33 = vshll.u32 %v573_v32, %v43_v20  ;;  %v58_v35 = vshll.u32 %v574_v34, %v43_v20  ;;  %vm61_vm2 = vcmp.lt.s32.totalorder %v42_v19, 1  ;;  %vm62_vm3 = vcmp.lt.s32.totalorder %v42_v19, 2 }
  0x20   :  { %v45_v37 = vshrl.u32 %v570_v26, %v44_v25  ;;  %v47_v38 = vshrl.u32 %v571_v28, %v44_v25  ;;  %v50_v39 = vshrl.u32 %v572_v30, %v44_v25  ;;  %v53_v40 = vshrl.u32 %v573_v32, %v44_v25 }
  0x21   :  { %v56_v41 = vshrl.u32 %v574_v34, %v44_v25  ;;  %v59_v43 = vshrl.u32 %v575_v42, %v44_v25  ;;  %vm64_vm4 = vcmp.lt.s32.totalorder %v42_v19, 4  ;;  %v251_v47 = vsub.s32 32, %v250_v23 }
  0x22   :  { %v48_v44 = vor.u32 %v47_v38, %v46_v27  ;;  %v51_v45 = vor.u32 %v50_v39, %v49_v29  ;;  %v54_v46 = vor.u32 %v53_v40, %v52_v31  ;;  %vm63_vm5 = vcmp.lt.s32.totalorder %v42_v19, 3 }
  0x23   :  { %v57_v48 = vor.u32 %v56_v41, %v55_v33  ;;  %v60_v49 = vor.u32 %v59_v43, %v58_v35  ;;  %v253_v50 = vshll.u32 %v570_v26, %v250_v23  ;;  %v256_v58 = vshll.u32 %v571_v28, %v250_v23 }
  0x24   :  { %v65_v51 = vsel %vm61_vm2, %v45_v37, %v48_v44  ;;  %v66_v52 = vsel %vm64_vm4, %v54_v46, 2102212464  ;;  %v69_v53 = vsel %vm61_vm2, %v48_v44, %v51_v45  ;;  %v73_v54 = vsel %vm61_vm2, %v51_v45, %v54_v46 }
  0x25   :  { %v67_v55 = vsel %vm63_vm5, %v51_v45, %v66_v52  ;;  %v70_v56 = vsel %vm64_vm4, %v57_v48, 920167782  ;;  %v74_v57 = vsel %vm64_vm4, %v60_v49, 1326507024  ;;  %v252_v61 = vshrl.u32 %v570_v26, %v251_v47 }
  0x26   :  { %v71_v59 = vsel %vm63_vm5, %v54_v46, %v70_v56  ;;  %v75_v60 = vsel %vm63_vm5, %v57_v48, %v74_v57  ;;  %v254_v62 = vshrl.u32 %v571_v28, %v251_v47  ;;  %v68_v63 = vsel %vm62_vm3, %v65_v51, %v67_v55 }
  0x27   :  { %v72_v0 = vsel %vm62_vm3, %v69_v53, %v71_v59  ;;  %v76_v1 = vsel %vm62_vm3, %v73_v54, %v75_v60  ;;  %v257_v5 = vshrl.u32 %v572_v30, %v251_v47  ;;  %v259_v13 = vshll.u32 %v572_v30, %v250_v23 }
  0x28   :  { %v625_v7 = vmul.u32.u64.low %v612_v22, %v76_v1  ;;  %v626_v8 = vmul.u32.u64.high %v612_v22, %v76_v1, %v625_v7  ;;  %v629_v9 = vmul.u32.u64.low %v612_v22, %v72_v0  ;;  %v630_v10 = vmul.u32.u64.high %v612_v22, %v72_v0, %v629_v9 }
  0x29   :  { %v255_v11 = vor.u32 %v254_v62, %v253_v50  ;;  %v258_v12 = vor.u32 %v257_v5, %v256_v58  ;;  %v260_v14 = vshrl.u32 %v573_v32, %v251_v47  ;;  %v262_v15 = vshll.u32 %v573_v32, %v250_v23 }
  0x2a   :  { %v263_v16 = vshrl.u32 %v574_v34, %v251_v47  ;;  %v265_v17 = vshll.u32 %v574_v34, %v250_v23  ;;  %v266_v18 = vshrl.u32 %v575_v42, %v251_v47  ;;  %v84_v19 = vmul.u32 %v612_v22, %v68_v63 }
  0x2b   :  { %v261_v20 = vor.u32 %v260_v14, %v259_v13  ;;  %vm268_vm6 = vcmp.lt.s32.totalorder %v616_v36, 1  ;;  %vm269_vm7 = vcmp.lt.s32.totalorder %v616_v36, 2  ;;  %vm86_vm8 = vc.u32 %v626_v8, %v629_v9 }
  0x2c   :  { %v87_v21 = vadd.s32 1, %v630_v10  ;;  %v264_v25 = vor.u32 %v263_v16, %v262_v15  ;;  %vm270_vm9 = vcmp.lt.s32.totalorder %v616_v36, 3  ;;  %v267_v26 = vor.u32 %v266_v18, %v265_v17 }
  0x2d   :  { %vm271_vm10 = vcmp.lt.s32.totalorder %v616_v36, 4  ;;  %v272_v27 = vsel %vm268_vm6, %v252_v61, %v255_v11  ;;  %v276_v23 = vsel %vm268_vm6, %v255_v11, %v258_v12  ;;  %v280_v30 = vsel %vm268_vm6, %v258_v12, %v261_v20 }
  0x2e   :  { %v88_v28 = vsel %vm86_vm8, %v87_v21, %v630_v10  ;;  %v273_v22 = vsel %vm271_vm10, %v261_v20, 2102212464  ;;  %v277_v29 = vsel %vm271_vm10, %v264_v25, 920167782  ;;  %v281_v34 = vsel %vm271_vm10, %v267_v26, 1326507024 }
  0x2f   :  { %v89_v31 = vadd.s32 %v88_v28, %v84_v19  ;;  %v274_v32 = vsel %vm270_vm9, %v258_v12, %v273_v22  ;;  %v278_v33 = vsel %vm270_vm9, %v261_v20, %v277_v29  ;;  %v282_v38 = vsel %vm270_vm9, %v264_v25, %v281_v34 }
  0x30   :  { %v275_v35 = vsel %vm269_vm7, %v272_v27, %v274_v32  ;;  %v279_v37 = vsel %vm269_vm7, %v276_v23, %v278_v33  ;;  %v283_v40 = vsel %vm269_vm7, %v280_v30, %v282_v38  ;;  %v85_v59 = vadd.s32 %v629_v9, %v626_v8 }
  0x31   :  { %v90_v39 = vadd.s32 536870912, %v89_v31  ;;  %v647_v41 = vmul.u32.u64.low %v614_v24, %v279_v37  ;;  %v648_v42 = vmul.u32.u64.high %v614_v24, %v279_v37, %v647_v41  ;;  %v291_v46 = vmul.u32 %v614_v24, %v275_v35 }
  0x32   :  { %v651_v43 = vmul.u32.u64.low %v614_v24, %v283_v40  ;;  %v652_v44 = vmul.u32.u64.high %v614_v24, %v283_v40, %v651_v43  ;;  %vm121_vm8 = vweird.f32 %v600_v2 }
  0x33   :  { %v91_v45 = vshrl.u32 %v90_v39, 30  ;;  %v294_v48 = vadd.s32 1, %v648_v42 }
  0x34   :  { %vm293_vm11 = vc.u32 %v652_v44, %v647_v41  ;;  %v292_v15 = vadd.s32 %v647_v41, %v652_v44 }
  0x35   :  { %v92_v47 = vshll.u32 %v91_v45, 30  ;;  %v295_v36 = vsel %vm293_vm11, %v294_v48, %v648_v42  ;;  %v115_v22 = vsub.s32 4, %v91_v45 }
  0x36   :  { %v296_v50 = vadd.s32 %v295_v36, %v291_v46 }
  0x37   :  { %v93_v49 = vsub.s32 %v89_v31, %v92_v47  ;;  %v116_v33 = vsel %vm31_vm14, %v115_v22, %v91_v45  ;;  %v473_v22 = vstv %s693_s21 }
  0x38   :  { %v297_v52 = vadd.s32 536870912, %v296_v50  ;;  %v118_v37 = vsel %vm663_vm15, 0, %v116_v33 }
  0x39   :  { %v95_v51 = vsub.s32 0, %v93_v49  ;;  %v225_v41 = vadd.s32 3, %v118_v37  ;;  %v122_v44 = vand.u32 3, %v118_v37 }
  0x3a   :  { %v298_v54 = vshrl.u32 %v297_v52, 30 }
  0x3b   :  { %v507_v53 = vmin.u32 %v95_v51, %v93_v49  ;;  %v226_v45 = vand.u32 3, %v225_v41  ;;  %vm124_vm2 = vcmp.eq.s32.totalorder %v122_v44, 0  ;;  %vm127_vm3 = vcmp.eq.s32.totalorder %v122_v44, 2 }
  0x3c   :  { %v299_v56 = vshll.u32 %v298_v54, 30  ;;  %v322_v4 = vsub.s32 4, %v298_v54  ;;  %vm123_vm6 = vcmp.lt.s32.totalorder %v122_v44, 2  ;;  %v493_v44 = vstv %s530_s25 }
  0x3d   :  { %v97_v55 = vclz %v507_v53  ;;  %vm228_vm4 = vcmp.eq.s32.totalorder %v226_v45, 0  ;;  %vm231_vm5 = vcmp.eq.s32.totalorder %v226_v45, 2  ;;  %vm227_vm7 = vcmp.lt.s32.totalorder %v226_v45, 2 }
  0x3e   :  { %v300_v58 = vsub.s32 %v296_v50, %v299_v56  ;;  %v323_v39 = vsel %vm238_vm0, %v322_v4, %v298_v54 }
  0x3f   :  { %v508_v57 = vadd.s32 4294967294, %v97_v55  ;;  %v325_v42 = vsel %vm237_vm1, 0, %v323_v39 }
  0x40   :  { %v302_v60 = vsub.s32 0, %v300_v58  ;;  %v432_v47 = vadd.s32 3, %v325_v42  ;;  %v329_v6 = vand.u32 3, %v325_v42 }
  0x41   :  { %vm509_vm12 = vcmp.lt.s32.totalorder %v508_v57, 0 }
  0x42   :  { %v100_v24 = vsel %vm509_vm12, 0, %v508_v57  ;;  %v515_v0 = vmin.u32 %v302_v60, %v300_v58  ;;  %v433_v36 = vand.u32 3, %v432_v47  ;;  %vm331_vm9 = vcmp.eq.s32.totalorder %v329_v6, 0 }
  0x43   :  { %v101_v61 = vsub.s32 32, %v100_v24  ;;  %v102_v62 = vshll.u32 %v93_v49, %v100_v24  ;;  %v105_v63 = vsub.s32 4294967266, %v100_v24  ;;  %vm334_vm10 = vcmp.eq.s32.totalorder %v329_v6, 2 }
  0x44   :  { %v304_v7 = vclz %v515_v0  ;;  %vm438_vm11 = vcmp.eq.s32.totalorder %v433_v36, 2  ;;  %vm435_vm12 = vcmp.eq.s32.totalorder %v433_v36, 0 }
  0x45   :  { %v103_v1 = vshrl.u32 %v85_v59, %v101_v61  ;;  %v106_v5 = vadd.s32 127, %v105_v63 }
  0x46   :  { %v516_v12 = vadd.s32 4294967294, %v304_v7 }
  0x47   :  { %v104_v10 = vor.u32 %v103_v1, %v102_v62  ;;  %v107_v11 = vshll.u32 %v106_v5, 23 }
  0x48   :  { %vm517_vm13 = vcmp.lt.s32.totalorder %v516_v12, 0 }
  0x49   :  { %v108_v13 = vor.u32 4788187, %v107_v11  ;;  %v111_v14 = vcvt.s32.f32 %v104_v10  ;;  %v307_v8 = vsel %vm517_vm13, 0, %v516_v12  ;;  %vm330_vm13 = vcmp.lt.s32.totalorder %v329_v6, 2 }
  0x4a   :  { %v308_v9 = vsub.s32 32, %v307_v8  ;;  %v309_v17 = vshll.u32 %v300_v58, %v307_v8  ;;  %v312_v18 = vsub.s32 4294967266, %v307_v8  ;;  %v497_v6 = vstv %s531_s26 }
  0x4b   :  { %v109_v16 = vand.u32 2147483647, %v108_v13 }
  0x4c   :  { %v310_v20 = vshrl.u32 %v292_v15, %v308_v9  ;;  %v313_v21 = vadd.s32 127, %v312_v18  ;;  %v458_v15 = vstv %s681_s18  ;;  %v463_v18 = vstv %s683_s19 }
  0x4d   :  { %v112_v19 = vmul.f32 %v111_v14, %v109_v16  ;;  %v453_v14 = vstv %s678_s1 }
  0x4e   :  { %v311_v27 = vor.u32 %v310_v20, %v309_v17  ;;  %v314_v23 = vshll.u32 %v313_v21, 23 }
  0x4f   :  { %v113_v26 = vxor.u32 2147483648, %v112_v19 }
  0x50   :  { %v315_v30 = vor.u32 4788187, %v314_v23  ;;  %v318_v31 = vcvt.s32.f32 %v311_v27 }
  0x51   :  { %v114_v28 = vsel %vm31_vm14, %v113_v26, %v112_v19  ;;  %vm434_vm14 = vcmp.lt.s32.totalorder %v433_v36, 2  ;;  %v468_v26 = vstv %s691_s20 }
  0x52   :  { %v117_v29 = vsel %vm663_vm15, %v600_v2, %v114_v28  ;;  %v316_v32 = vand.u32 2147483647, %v315_v30  ;;  %vm328_vm15 = vweird.f32 %v602_v3  ;;  %v449_v2 = vstv %s676_s0 }
  0x53   :  { %547 = vcosq.f32 %v117_v29 }
  0x54   :  { %549 = vsinq.f32 %v117_v29  ;;  %v319_v34 = vmul.f32 %v318_v31, %v316_v32  ;;  %v478_v32 = vstv %s527_s22 }
  0x56   :  { %v320_v35 = vxor.u32 2147483648, %v319_v34 }
  0x58   :  { %v321_v38 = vsel %vm238_vm0, %v320_v35, %v319_v34  ;;  %v483_v35 = vstv %s528_s23 }
  0x59   :  { %v324_v40 = vsel %vm237_vm1, %v602_v3, %v321_v38 }
  0x5a   :  { %551 = vcosq.f32 %v324_v40 }
  0x5b   :  { %553 = vsinq.f32 %v324_v40  ;;  %v488_v40 = vstv %s529_s24 }
  0x60   :  { %v548_v43 = vpop.eup %547 }
  0x61   :  { %v550_v46 = vpop.eup %549  ;;  %v128_v49 = vxor.u32 2147483648, %v548_v43 }
  0x62   :  { %v125_v48 = vxor.u32 2147483648, %v550_v46 }
  0x63   :  { %v129_v51 = vsel %vm127_vm3, %v128_v49, %v550_v46  ;;  %v233_v53 = vsel %vm231_vm5, %v128_v49, %v550_v46 }
  0x64   :  { %v126_v50 = vsel %vm124_vm2, %v548_v43, %v125_v48  ;;  %v230_v52 = vsel %vm228_vm4, %v548_v43, %v125_v48 }
  0x65   :  { %v130_v56 = vsel %vm123_vm6, %v126_v50, %v129_v51  ;;  %v234_v57 = vsel %vm227_vm7, %v230_v52, %v233_v53 }
  0x66   :  { %v131_v61 = vsel %vm121_vm8, nan, %v130_v56  ;;  %v235_v62 = vsel %vm121_vm8, nan, %v234_v57 }
  0x67   :  { %v552_v54 = vpop.eup %551 }
  0x68   :  { %v554_v55 = vpop.eup %553  ;;  %v335_v58 = vxor.u32 2147483648, %v552_v54 }
  0x69   :  { %v332_v59 = vxor.u32 2147483648, %v554_v55 }
  0x6a   :  { %v336_v24 = vsel %vm334_vm10, %v335_v58, %v554_v55  ;;  %v440_v60 = vsel %vm438_vm11, %v335_v58, %v554_v55 }
  0x6b   :  { %v333_v63 = vsel %vm331_vm9, %v552_v54, %v332_v59  ;;  %v437_v0 = vsel %vm435_vm12, %v552_v54, %v332_v59 }
  0x6c   :  { %v337_v1 = vsel %vm330_vm13, %v333_v63, %v336_v24  ;;  %v441_v5 = vsel %vm434_vm14, %v437_v0, %v440_v60 }
  0x6d   :  { %v338_v3 = vsel %vm328_vm15, nan, %v337_v1  ;;  %v442_v7 = vsel %vm328_vm15, nan, %v441_v5 }
  0x6e   :  { %v443_v10 = vmul.f32 %v338_v3, %v131_v61  ;;  %v444_v11 = vmul.f32 %v442_v7, %v235_v62  ;;  %v445_v12 = vmul.f32 %v442_v7, %v131_v61  ;;  %v446_v13 = vmul.f32 %v338_v3, %v235_v62 }
  0x70   :  { %v448_v16 = vmul.f32 %v443_v10, %v443_v10  ;;  %v452_v8 = vmul.f32 %v444_v11, %v443_v10  ;;  %v457_v9 = vmul.f32 %v444_v11, %v444_v11  ;;  %v462_v17 = vmul.f32 %v445_v12, %v445_v12 }
  0x71   :  { %v467_v25 = vmul.f32 %v446_v13, %v445_v12  ;;  %v472_v28 = vmul.f32 %v446_v13, %v446_v13  ;;  %v477_v31 = vmul.f32 %v445_v12, %v443_v10  ;;  %v482_v4 = vmul.f32 %v446_v13, %v443_v10 }
  0x72   :  { %v450_v19 = vmul.f32 %v449_v2, %v448_v16  ;;  %v454_v20 = vmul.f32 %v453_v14, %v452_v8  ;;  %v459_v21 = vmul.f32 %v458_v15, %v457_v9  ;;  %v464_v23 = vmul.f32 %v463_v18, %v462_v17 }
  0x73   :  { %v469_v30 = vmul.f32 %v468_v26, %v467_v25  ;;  %v474_v34 = vmul.f32 %v473_v22, %v472_v28  ;;  %v479_v38 = vmul.f32 %v478_v32, %v477_v31  ;;  %v487_v39 = vmul.f32 %v445_v12, %v444_v11 }
  0x74   :  { %v455_v27 = vadd.f32 %v454_v20, %v450_v19  ;;  %v484_v42 = vmul.f32 %v483_v35, %v482_v4  ;;  %v492_v43 = vmul.f32 %v446_v13, %v444_v11 }
  0x75   :  { %v489_v46 = vmul.f32 %v488_v40, %v487_v39 }
  0x76   :  { %v460_v29 = vadd.f32 %v459_v21, %v455_v27  ;;  %v494_v48 = vmul.f32 %v493_v44, %v492_v43 }
  0x78   :  { %v465_v33 = vadd.f32 %v464_v23, %v460_v29 }
  0x7a   :  { %v470_v37 = vadd.f32 %v469_v30, %v465_v33 }
  0x7c   :  { %v475_v41 = vadd.f32 %v474_v34, %v470_v37 }
  0x7e   :  { %v480_v45 = vadd.f32 %v479_v38, %v475_v41 }
  0x80   :  { %v485_v47 = vadd.f32 %v484_v42, %v480_v45 }
  0x82   :  { %v490_v49 = vadd.f32 %v489_v46, %v485_v47 }
  0x84   :  { %v495_v36 = vadd.f32 %v494_v48, %v490_v49 }
  0x86   :  { %v498_v50 = vadd.f32 %v497_v6, %v495_v36 }
  0x88   :  { %499 = vst [vmem:[%s706_s2] sm:$0xff] %v498_v50 }
  0x89   :  { %504 = vsyncpa [#allocation3], 1 }

</bundles_post_ra>
